<compile_context>
chip_gen: v7x
topology: tpu7x:2x2x1
jax: 0.10.0
libtpu: 0.0.40
codegen_flags: <defaults>
</compile_context>

<pallas_src>
import jax
import jax.numpy as jnp
from jax.experimental import pallas as pl
from jax.experimental.pallas import tpu as pltpu


LANE = 128        # TPU lane width: hidden/output feature dims padded to this.
SUBLANE = 8       # f32 sublane multiple: batch rows / input features padded to this.


def _round_up(x, m):
    return ((x + m - 1) // m) * m


# --------------------------------------------------------------------------- #
# Pallas kernel: 4-layer MLP on a (tile_b, FP_IN) batch tile.
# t is an SMEM scalar; its contribution is the rank-1 term t * w1_t folded into
# the first-layer bias.  Matmul operands are bf16, accumulation/elementwise f32.
# --------------------------------------------------------------------------- #
def _odefunc_kernel(t_ref, y_ref, w1y_ref, w1t_ref, b1_ref,
                    w2_ref, b2_ref, w3_ref, b3_ref, w4_ref, b4_ref, out_ref):
    t = t_ref[0, 0]                                             # SMEM scalar
    bias1 = t * w1t_ref[...] + b1_ref[...]                      # (1, HP) f32, once per tile

    y = y_ref[...].astype(jnp.bfloat16)                         # (tile_b, FP_IN)
    h = jnp.dot(y, w1y_ref[...], preferred_element_type=jnp.float32)
    h = jnp.maximum(h + bias1, 0.0)                             # f32 ReLU

    h = jnp.maximum(
        jnp.dot(h.astype(jnp.bfloat16), w2_ref[...],
                preferred_element_type=jnp.float32) + b2_ref[...], 0.0)
    h = jnp.maximum(
        jnp.dot(h.astype(jnp.bfloat16), w3_ref[...],
                preferred_element_type=jnp.float32) + b3_ref[...], 0.0)
    o = jnp.dot(h.astype(jnp.bfloat16), w4_ref[...],
                preferred_element_type=jnp.float32) + b4_ref[...]
    out_ref[...] = o.astype(out_ref.dtype)                      # (tile_b, 128) lane-dense


# --------------------------------------------------------------------------- #
# One-time parameter preparation: split w1 into (y, t) parts, pad hidden/output
# dims to 128 lanes and the state-feature dim to 8 sublanes, cast matmul weights
# to bf16 (biases / time row stay f32 for the elementwise path).
# --------------------------------------------------------------------------- #
def pad_params_for_kernel(params, *, y_dim, h_dim, exclude_time):
    FP_IN = _round_up(max(y_dim, 1), SUBLANE)   # padded state-feature width (8)
    HP = _round_up(h_dim, LANE)                 # padded hidden width (128)
    OP = _round_up(y_dim, LANE)                 # padded output width (128)

    w1 = jnp.asarray(params["w1"], jnp.float32)                 # (inp_dim, h_dim)
    if exclude_time:
        w1_y = w1                                               # (y_dim, h_dim)
        w1_t = jnp.zeros((1, h_dim), jnp.float32)               # time term vanishes
    else:
        w1_y = w1[:y_dim, :]                                    # rows for y
        w1_t = w1[y_dim:y_dim + 1, :]                           # row for t (last concat slot)

    def pad2(a, rows, cols, dtype):
        a = jnp.asarray(a, jnp.float32)
        out = jnp.zeros((rows, cols), jnp.float32).at[:a.shape[0], :a.shape[1]].set(a)
        return out.astype(dtype)

    padded = {
        "w1y": pad2(w1_y, FP_IN, HP, jnp.bfloat16),
        "w1t": pad2(w1_t, 1, HP, jnp.float32),
        "b1":  pad2(params["b1"], 1, HP, jnp.float32),
        "w2":  pad2(params["w2"], HP, HP, jnp.bfloat16),
        "b2":  pad2(params["b2"], 1, HP, jnp.float32),
        "w3":  pad2(params["w3"], HP, HP, jnp.bfloat16),
        "b3":  pad2(params["b3"], 1, HP, jnp.float32),
        "w4":  pad2(params["w4"], HP, OP, jnp.bfloat16),
        "b4":  pad2(params["b4"], 1, OP, jnp.float32),
    }
    meta = {"FP_IN": FP_IN, "HP": HP, "OP": OP, "y_dim": y_dim}
    return padded, meta


def _tensorcores_per_chip():
    # v7x has 2 TensorCores per chip; v5e/v6e have 1.
    try:
        kind = jax.devices()[0].device_kind.lower()
    except Exception:
        return 1
    return 2 if "v7" in kind else 1


def _choose_tiling(B, max_tile_b, n_cores):
    if B <= max_tile_b:
        # Fixed set of tile shapes (powers of two, >= 8) -> no per-B recompiles.
        b_pad = max(SUBLANE, int(pl.next_power_of_2(B)))
        if n_cores >= 2 and b_pad >= 2 * SUBLANE:
            tile_b = b_pad // 2          # >= 2 grid steps so both v7x TCs work
        else:
            tile_b = b_pad               # single biggest tile on v5e/v6e
    else:
        b_pad = _round_up(B, max_tile_b)
        tile_b = max_tile_b              # grid has >= 2 steps automatically
    return b_pad, tile_b


# --------------------------------------------------------------------------- #
# Wrapper: equivalent of ApplicationODEFunc.forward(t, y).
#   y may be a single state (y_dim,) -- exact PyTorch semantics -- or a batch
#   (B, y_dim) of independent states sharing the same t (the performance path).
# --------------------------------------------------------------------------- #
def application_ode_func(t, y, padded_params, meta, *, exclude_time=False,
                         max_tile_b=512):
    FP_IN, HP, OP, y_dim = meta["FP_IN"], meta["HP"], meta["OP"], meta["y_dim"]

    single = (y.ndim == 1)
    yb = y.reshape(1, -1) if single else y
    B = yb.shape[0]

    n_cores = _tensorcores_per_chip()
    b_pad, tile_b = _choose_tiling(B, max_tile_b, n_cores)
    grid = (b_pad // tile_b,)

    # Pad rows to b_pad and features to FP_IN (8).  Padded rows are zero on
    # input, but the padded OUTPUT rows still contain ReLU(t*w1t + b1) garbage;
    # they are sliced off below.  Do not reduce over / alias the padded output
    # buffer without masking those rows first.
    if B == b_pad and yb.shape[1] == FP_IN and yb.dtype == jnp.float32:
        y_in = yb
    else:
        y_in = (jnp.zeros((b_pad, FP_IN), jnp.float32)
                .at[:B, :y_dim].set(yb.astype(jnp.float32)))

    if exclude_time:
        t_arr = jnp.zeros((1, 1), jnp.float32)          # w1t is zero anyway
    else:
        t_arr = jnp.reshape(jnp.asarray(t, jnp.float32), (1, 1))

    smem_spec = pl.BlockSpec(memory_space=pltpu.MemorySpace.SMEM)

    def const_spec(rows, cols):
        # Same block every grid step -> stays resident in VMEM across tiles.
        return pl.BlockSpec((rows, cols), lambda i: (0, 0))

    out = pl.pallas_call(
        _odefunc_kernel,
        out_shape=jax.ShapeDtypeStruct((b_pad, OP), jnp.float32),
        grid=grid,
        in_specs=[
            smem_spec,                                        # t (SMEM scalar)
            pl.BlockSpec((tile_b, FP_IN), lambda i: (i, 0)),  # y batch tile
            const_spec(FP_IN, HP),                            # w1y (bf16)
            const_spec(1, HP),                                # w1t (f32)
            const_spec(1, HP),                                # b1  (f32)
            const_spec(HP, HP),                               # w2  (bf16)
            const_spec(1, HP),                                # b2  (f32)
            const_spec(HP, HP),                               # w3  (bf16)
            const_spec(1, HP),                                # b3  (f32)
            const_spec(HP, OP),                               # w4  (bf16)
            const_spec(1, OP),                                # b4  (f32)
        ],
        out_specs=pl.BlockSpec((tile_b, OP), lambda i: (i, 0)),
        compiler_params=pltpu.CompilerParams(
            dimension_semantics=("parallel",)),               # batch axis shards on v7x
    )(t_arr, y_in,
      padded_params["w1y"], padded_params["w1t"], padded_params["b1"],
      padded_params["w2"], padded_params["b2"],
      padded_params["w3"], padded_params["b3"],
      padded_params["w4"], padded_params["b4"])

    out = out[:B, :y_dim]
    return out.reshape(y_dim) if single else out


# --------------------------------------------------------------------------- #
# Deterministic parameter init (mirrors nn.init.normal_(std=0.1), bias=0).
# Weights stored (in_features, out_features) so the kernel computes x @ W + b.
# --------------------------------------------------------------------------- #
def init_params(key, inp_dim, h_dim, y_dim):
    keys = jax.random.split(key, 4)
    layer_dims = [(inp_dim, h_dim), (h_dim, h_dim), (h_dim, h_dim), (h_dim, y_dim)]
    params = {}
    for i, ((d_in, d_out), k) in enumerate(zip(layer_dims, keys), start=1):
        params[f"w{i}"] = 0.1 * jax.random.normal(k, (d_in, d_out), jnp.float32)
        params[f"b{i}"] = jnp.zeros((1, d_out), jnp.float32)
    return params


# Pure-JAX (f32) reference for correctness checking.
def _reference(t, y, params, *, exclude_time=False):
    single = (y.ndim == 1)
    yb = y.reshape(1, -1) if single else y
    if not exclude_time:
        tcol = jnp.full((yb.shape[0], 1), jnp.asarray(t, yb.dtype))
        yb = jnp.concatenate([yb, tcol], axis=1)
    h = jnp.maximum(yb @ params["w1"] + params["b1"], 0.0)
    h = jnp.maximum(h @ params["w2"] + params["b2"], 0.0)
    h = jnp.maximum(h @ params["w3"] + params["b3"], 0.0)
    o = h @ params["w4"] + params["b4"]
    return o.reshape(-1) if single else o


if __name__ == "__main__":
    # Small shapes consistent with the module: t_dim=1, y_dim=4, h_dim=32.
    t_dim, h_dim, y_dim = 1, 32, 4
    exclude_time = False
    inp_dim = y_dim if exclude_time else y_dim + t_dim

    root = jax.random.PRNGKey(0)
    k_param, k_y, k_t, k_yb, k_big = jax.random.split(root, 5)

    params = init_params(k_param, inp_dim, h_dim, y_dim)
    padded, meta = pad_params_for_kernel(
        params, y_dim=y_dim, h_dim=h_dim, exclude_time=exclude_time)

    # bf16 MXU operands with f32 accumulation -> compare to the f32 reference
    # with a modest tolerance.
    ATOL = RTOL = 1e-2

    # 1) Single state: exactly the PyTorch module's forward(t, y) semantics.
    y = jax.random.normal(k_y, (y_dim,), jnp.float32)
    t = jax.random.uniform(k_t, (), jnp.float32)
    out = jax.block_until_ready(
        application_ode_func(t, y, padded, meta, exclude_time=exclude_time))
    ref = _reference(t, y, params, exclude_time=exclude_time)
    assert out.shape == (y_dim,)
    assert jnp.allclose(out, ref, atol=ATOL, rtol=RTOL), (out, ref)

    # 2) Small batch of independent ODE states sharing t.
    B = 16
    yb = jax.random.normal(k_yb, (B, y_dim), jnp.float32)
    outb = jax.block_until_ready(
        application_ode_func(t, yb, padded, meta, exclude_time=exclude_time))
    refb = _reference(t, yb, params, exclude_time=exclude_time)
    assert outb.shape == (B, y_dim)
    assert jnp.allclose(outb, refb, atol=ATOL, rtol=RTOL), (outb, refb)

    # 3) Larger batch exercising the multi-tile grid path (still tiny data).
    Bb = 600
    ybig = jax.random.normal(k_big, (Bb, y_dim), jnp.float32)
    outbig = jax.block_until_ready(
        application_ode_func(t, ybig, padded, meta, exclude_time=exclude_time))
    refbig = _reference(t, ybig, params, exclude_time=exclude_time)
    assert outbig.shape == (Bb, y_dim)
    assert jnp.allclose(outbig, refbig, atol=ATOL, rtol=RTOL)

    print("KERNEL_OK")
</pallas_src>

<mosaic_0001>
module attributes {stable_mosaic.version = 11 : i64} {
  func.func @_odefunc_kernel(%arg0: i32, %arg1: memref<1x1xf32, #tpu.memory_space<smem>>, %arg2: memref<8x8xf32, #tpu.memory_space<vmem>>, %arg3: memref<8x128xbf16, #tpu.memory_space<vmem>>, %arg4: memref<1x128xf32, #tpu.memory_space<vmem>>, %arg5: memref<1x128xf32, #tpu.memory_space<vmem>>, %arg6: memref<128x128xbf16, #tpu.memory_space<vmem>>, %arg7: memref<1x128xf32, #tpu.memory_space<vmem>>, %arg8: memref<128x128xbf16, #tpu.memory_space<vmem>>, %arg9: memref<1x128xf32, #tpu.memory_space<vmem>>, %arg10: memref<128x128xbf16, #tpu.memory_space<vmem>>, %arg11: memref<1x128xf32, #tpu.memory_space<vmem>>, %arg12: memref<8x128xf32, #tpu.memory_space<vmem>>) attributes {dimension_semantics = [#tpu.dimension_semantics<parallel>], iteration_bounds = array<i64: 1>, scalar_prefetch = 0 : i64, scratch_operands = 0 : i64, tpu.core_type = #tpu.core_type<tc>, window_params = [{transform_indices = @transform_0, window_bounds = array<i64: 1, 1>}, {transform_indices = @transform_1, window_bounds = array<i64: 8, 8>}, {pipeline_mode = #tpu.pipeline_mode<synchronous>, transform_indices = @transform_2, window_bounds = array<i64: 8, 128>}, {pipeline_mode = #tpu.pipeline_mode<synchronous>, transform_indices = @transform_3, window_bounds = array<i64: 1, 128>}, {pipeline_mode = #tpu.pipeline_mode<synchronous>, transform_indices = @transform_4, window_bounds = array<i64: 1, 128>}, {pipeline_mode = #tpu.pipeline_mode<synchronous>, transform_indices = @transform_5, window_bounds = array<i64: 128, 128>}, {pipeline_mode = #tpu.pipeline_mode<synchronous>, transform_indices = @transform_6, window_bounds = array<i64: 1, 128>}, {pipeline_mode = #tpu.pipeline_mode<synchronous>, transform_indices = @transform_7, window_bounds = array<i64: 128, 128>}, {pipeline_mode = #tpu.pipeline_mode<synchronous>, transform_indices = @transform_8, window_bounds = array<i64: 1, 128>}, {pipeline_mode = #tpu.pipeline_mode<synchronous>, transform_indices = @transform_9, window_bounds = array<i64: 128, 128>}, {pipeline_mode = #tpu.pipeline_mode<synchronous>, transform_indices = @transform_10, window_bounds = array<i64: 1, 128>}, {transform_indices = @transform_11, window_bounds = array<i64: 8, 128>}]} {
    %c0 = arith.constant 0 : index
    %c0_0 = arith.constant 0 : index
    %0 = memref.load %arg1[%c0, %c0_0] : memref<1x1xf32, #tpu.memory_space<smem>>
    %c0_1 = arith.constant 0 : index
    %c0_2 = arith.constant 0 : index
    %1 = vector.load %arg4[%c0_1, %c0_2] : memref<1x128xf32, #tpu.memory_space<vmem>>, vector<1x128xf32>
    %2 = vector.broadcast %0 : f32 to vector<1x128xf32>
    %3 = arith.mulf %2, %1 : vector<1x128xf32>
    %c0_3 = arith.constant 0 : index
    %c0_4 = arith.constant 0 : index
    %4 = vector.load %arg5[%c0_3, %c0_4] : memref<1x128xf32, #tpu.memory_space<vmem>>, vector<1x128xf32>
    %5 = arith.addf %3, %4 : vector<1x128xf32>
    %c0_5 = arith.constant 0 : index
    %c0_6 = arith.constant 0 : index
    %6 = vector.load %arg2[%c0_5, %c0_6] : memref<8x8xf32, #tpu.memory_space<vmem>>, vector<8x8xf32>
    %7 = arith.truncf %6 : vector<8x8xf32> to vector<8x8xbf16>
    %c0_7 = arith.constant 0 : index
    %c0_8 = arith.constant 0 : index
    %8 = vector.load %arg3[%c0_7, %c0_8] : memref<8x128xbf16, #tpu.memory_space<vmem>>, vector<8x128xbf16>
    %cst = arith.constant dense<0.000000e+00> : vector<8x128xf32>
    %9 = tpu.matmul %7, %8, %cst {dimension_numbers = #tpu.dot_dimension_numbers<[1], [0], [0], [1], [0, 0, 1, 1], [], []>} : vector<8x8xbf16>, vector<8x128xbf16>, vector<8x128xf32> -> vector<8x128xf32>
    %10 = vector.broadcast %5 : vector<1x128xf32> to vector<8x128xf32>
    %11 = arith.addf %9, %10 : vector<8x128xf32>
    %cst_9 = arith.constant 0.000000e+00 : f32
    %12 = vector.broadcast %cst_9 : f32 to vector<8x128xf32>
    %13 = arith.maximumf %11, %12 : vector<8x128xf32>
    %14 = arith.truncf %13 : vector<8x128xf32> to vector<8x128xbf16>
    %c0_10 = arith.constant 0 : index
    %c0_11 = arith.constant 0 : index
    %15 = vector.load %arg6[%c0_10, %c0_11] : memref<128x128xbf16, #tpu.memory_space<vmem>>, vector<128x128xbf16>
    %cst_12 = arith.constant dense<0.000000e+00> : vector<8x128xf32>
    %16 = tpu.matmul %14, %15, %cst_12 {dimension_numbers = #tpu.dot_dimension_numbers<[1], [0], [0], [1], [0, 0, 1, 1], [], []>} : vector<8x128xbf16>, vector<128x128xbf16>, vector<8x128xf32> -> vector<8x128xf32>
    %c0_13 = arith.constant 0 : index
    %c0_14 = arith.constant 0 : index
    %17 = vector.load %arg7[%c0_13, %c0_14] : memref<1x128xf32, #tpu.memory_space<vmem>>, vector<1x128xf32>
    %18 = vector.broadcast %17 : vector<1x128xf32> to vector<8x128xf32>
    %19 = arith.addf %16, %18 : vector<8x128xf32>
    %cst_15 = arith.constant 0.000000e+00 : f32
    %20 = vector.broadcast %cst_15 : f32 to vector<8x128xf32>
    %21 = arith.maximumf %19, %20 : vector<8x128xf32>
    %22 = arith.truncf %21 : vector<8x128xf32> to vector<8x128xbf16>
    %c0_16 = arith.constant 0 : index
    %c0_17 = arith.constant 0 : index
    %23 = vector.load %arg8[%c0_16, %c0_17] : memref<128x128xbf16, #tpu.memory_space<vmem>>, vector<128x128xbf16>
    %cst_18 = arith.constant dense<0.000000e+00> : vector<8x128xf32>
    %24 = tpu.matmul %22, %23, %cst_18 {dimension_numbers = #tpu.dot_dimension_numbers<[1], [0], [0], [1], [0, 0, 1, 1], [], []>} : vector<8x128xbf16>, vector<128x128xbf16>, vector<8x128xf32> -> vector<8x128xf32>
    %c0_19 = arith.constant 0 : index
    %c0_20 = arith.constant 0 : index
    %25 = vector.load %arg9[%c0_19, %c0_20] : memref<1x128xf32, #tpu.memory_space<vmem>>, vector<1x128xf32>
    %26 = vector.broadcast %25 : vector<1x128xf32> to vector<8x128xf32>
    %27 = arith.addf %24, %26 : vector<8x128xf32>
    %cst_21 = arith.constant 0.000000e+00 : f32
    %28 = vector.broadcast %cst_21 : f32 to vector<8x128xf32>
    %29 = arith.maximumf %27, %28 : vector<8x128xf32>
    %30 = arith.truncf %29 : vector<8x128xf32> to vector<8x128xbf16>
    %c0_22 = arith.constant 0 : index
    %c0_23 = arith.constant 0 : index
    %31 = vector.load %arg10[%c0_22, %c0_23] : memref<128x128xbf16, #tpu.memory_space<vmem>>, vector<128x128xbf16>
    %cst_24 = arith.constant dense<0.000000e+00> : vector<8x128xf32>
    %32 = tpu.matmul %30, %31, %cst_24 {dimension_numbers = #tpu.dot_dimension_numbers<[1], [0], [0], [1], [0, 0, 1, 1], [], []>} : vector<8x128xbf16>, vector<128x128xbf16>, vector<8x128xf32> -> vector<8x128xf32>
    %c0_25 = arith.constant 0 : index
    %c0_26 = arith.constant 0 : index
    %33 = vector.load %arg11[%c0_25, %c0_26] : memref<1x128xf32, #tpu.memory_space<vmem>>, vector<1x128xf32>
    %34 = vector.broadcast %33 : vector<1x128xf32> to vector<8x128xf32>
    %35 = arith.addf %32, %34 : vector<8x128xf32>
    %c0_27 = arith.constant 0 : index
    %c0_28 = arith.constant 0 : index
    %36 = vector.load %arg12[%c0_27, %c0_28] : memref<8x128xf32, #tpu.memory_space<vmem>>, vector<8x128xf32>
    tpu.vector_store %arg12[%c0_27, %c0_28], %35 {strides = array<i32>} : memref<8x128xf32, #tpu.memory_space<vmem>>, vector<8x128xf32>,
    return
  }
  func.func @transform_0(%arg0: i32) -> (i32, i32) {
    %c0_i32 = arith.constant 0 : i32
    %c0_i32_0 = arith.constant 0 : i32
    %c0_i32_1 = arith.constant 0 : i32
    return %c0_i32, %c0_i32_0 : i32, i32
  }
  func.func @transform_1(%arg0: i32) -> (i32, i32) {
    %c0_i32 = arith.constant 0 : i32
    %c0_i32_0 = arith.constant 0 : i32
    return %arg0, %c0_i32 : i32, i32
  }
  func.func @transform_2(%arg0: i32) -> (i32, i32) {
    %c0_i32 = arith.constant 0 : i32
    %c0_i32_0 = arith.constant 0 : i32
    %c0_i32_1 = arith.constant 0 : i32
    return %c0_i32, %c0_i32_0 : i32, i32
  }
  func.func @transform_3(%arg0: i32) -> (i32, i32) {
    %c0_i32 = arith.constant 0 : i32
    %c0_i32_0 = arith.constant 0 : i32
    %c0_i32_1 = arith.constant 0 : i32
    return %c0_i32, %c0_i32_0 : i32, i32
  }
  func.func @transform_4(%arg0: i32) -> (i32, i32) {
    %c0_i32 = arith.constant 0 : i32
    %c0_i32_0 = arith.constant 0 : i32
    %c0_i32_1 = arith.constant 0 : i32
    return %c0_i32, %c0_i32_0 : i32, i32
  }
  func.func @transform_5(%arg0: i32) -> (i32, i32) {
    %c0_i32 = arith.constant 0 : i32
    %c0_i32_0 = arith.constant 0 : i32
    %c0_i32_1 = arith.constant 0 : i32
    return %c0_i32, %c0_i32_0 : i32, i32
  }
  func.func @transform_6(%arg0: i32) -> (i32, i32) {
    %c0_i32 = arith.constant 0 : i32
    %c0_i32_0 = arith.constant 0 : i32
    %c0_i32_1 = arith.constant 0 : i32
    return %c0_i32, %c0_i32_0 : i32, i32
  }
  func.func @transform_7(%arg0: i32) -> (i32, i32) {
    %c0_i32 = arith.constant 0 : i32
    %c0_i32_0 = arith.constant 0 : i32
    %c0_i32_1 = arith.constant 0 : i32
    return %c0_i32, %c0_i32_0 : i32, i32
  }
  func.func @transform_8(%arg0: i32) -> (i32, i32) {
    %c0_i32 = arith.constant 0 : i32
    %c0_i32_0 = arith.constant 0 : i32
    %c0_i32_1 = arith.constant 0 : i32
    return %c0_i32, %c0_i32_0 : i32, i32
  }
  func.func @transform_9(%arg0: i32) -> (i32, i32) {
    %c0_i32 = arith.constant 0 : i32
    %c0_i32_0 = arith.constant 0 : i32
    %c0_i32_1 = arith.constant 0 : i32
    return %c0_i32, %c0_i32_0 : i32, i32
  }
  func.func @transform_10(%arg0: i32) -> (i32, i32) {
    %c0_i32 = arith.constant 0 : i32
    %c0_i32_0 = arith.constant 0 : i32
    %c0_i32_1 = arith.constant 0 : i32
    return %c0_i32, %c0_i32_0 : i32, i32
  }
  func.func @transform_11(%arg0: i32) -> (i32, i32) {
    %c0_i32 = arith.constant 0 : i32
    %c0_i32_0 = arith.constant 0 : i32
    return %arg0, %c0_i32 : i32, i32
  }
}

</mosaic_0001>

<bundles_post_ra>
// kernel: tpu_custom_call.1
= control target key start
LH: loop header
LB: loop body
LE: loop exit
PB: predicated region body
PF: predicated region fallthrough
CT: control target
= control target key end

     0   :  { %17 = vsyncpa [#allocation4], 0  ;;  %s980_s0 = inlined_call_operand.<no memory space> [shape: f32[1,1], index: 0, kind: input, shape index: {}]   ;;  %s981_s1 = inlined_call_operand.hbm [shape: f32[8,8], index: 1, kind: input, shape index: {}]   ;;  %s982_s2 = inlined_call_operand.vmem [shape: bf16[8,128], index: 2, kind: input, shape index: {}]   ;;  %s983_s3 = inlined_call_operand.vmem [shape: f32[1,128], index: 3, kind: input, shape index: {}]   ;;  %s984_s4 = inlined_call_operand.vmem [shape: f32[1,128], index: 4, kind: input, shape index: {}]   ;;  %s985_s5 = inlined_call_operand.hbm [shape: bf16[128,128], index: 5, kind: input, shape index: {}]   ;;  %s986_s6 = inlined_call_operand.vmem [shape: f32[1,128], index: 6, kind: input, shape index: {}]   ;;  %s987_s7 = inlined_call_operand.hbm [shape: bf16[128,128], index: 7, kind: input, shape index: {}]   ;;  %s988_s8 = inlined_call_operand.vmem [shape: f32[1,128], index: 8, kind: input, shape index: {}]   ;;  %s989_s9 = inlined_call_operand.hbm [shape: bf16[128,128], index: 9, kind: input, shape index: {}]   ;;  %s990_s10 = inlined_call_operand.vmem [shape: f32[1,128], index: 10, kind: input, shape index: {}]   ;;  %s991_s11 = inlined_call_operand.hbm [shape: f32[8,128], index: 11, kind: output, shape index: {}]  }
   0x1   :  { %18 = vsyncpa [#allocation7], 0 }
   0x2   :  { %19 = vsyncpa [#allocation10], 0 }
   0x3   :  { %20 = vsyncpa [#allocation5], 0  ;;  %s788_s17 = smov [#allocation6]   ;;  %s670_s21 = scalar_lea.hbm %s985_s5, 1024 }
   0x4   :  { %s44_s18 = sshll.u32 %s788_s17, 4  ;;  %p671_p0 = scmp.ne.s32.totalorder %s985_s5, %s670_s21  ;;  %s45_s18 = int_to_ptr.vmem [resolvable:$true] %s44_s18 }
   0x5   :  { %p674_p1 = scmp.lt.u32.totalorder %s670_s21, %s985_s5 }
   0x7   :  { %p676_p2 = pnand %p674_p1, %p671_p0 }
   0x9   :  { %679 = shalt.err (!%p676_p2)
}
   0xa   :  { %s680_s26 = scalar_lea.vmem %s45_s18, 1024  ;;  %p685_p4 = scmp.lt.s32.totalorder %s45_s18, %s45_s18 }
   0xb   :  { %p681_p3 = scmp.ne.s32.totalorder %s45_s18, %s680_s26  ;;  %p686_p5 = scmp.lt.s32.totalorder %s680_s26, %s680_s26 }
   0xd   :  { %p687_p6 = por %p686_p5, %p685_p4 }
   0xf   :  { %p688_p7 = pnand %p687_p6, %p681_p3 }
  0x11   :  { %691 = shalt.err (!%p688_p7)
}
  0x12   :  { %s789_s27 = smov 64   ;;  %s790_s28 = smov 4  }
  0x13   :  { %50 = dma.hbm_to_vmem [thread:$0]  %s985_s5, 1024, %s45_s18, [#allocation7], %s789_s27, %s789_s27, %s790_s28  }
  0x14   :  { %s791_s12 = smov [#allocation3]   ;;  %s792_s14 = smov [#allocation8]  }
  0x15   :  { %s29_s13 = sshll.u32 %s791_s12, 4  ;;  %s58_s15 = sshll.u32 %s792_s14, 4  ;;  %s30_s13 = int_to_ptr.vmem [resolvable:$true] %s29_s13  ;;  %s59_s15 = int_to_ptr.vmem [resolvable:$true] %s58_s15 }
  0x16   :  { %s692_s19 = scalar_lea.hbm %s981_s1, 128 }
  0x17   :  { %p693_p8 = scmp.ne.s32.totalorder %s981_s1, %s692_s19  ;;  %p696_p9 = scmp.lt.u32.totalorder %s692_s19, %s981_s1 }
  0x19   :  { %p698_p10 = pnand %p696_p9, %p693_p8 }
  0x1b   :  { %701 = shalt.err (!%p698_p10)
}
  0x1c   :  { %s702_s5 = scalar_lea.vmem %s30_s13, 128  ;;  %p707_p12 = scmp.lt.s32.totalorder %s30_s13, %s30_s13 }
  0x1d   :  { %p703_p11 = scmp.ne.s32.totalorder %s30_s13, %s702_s5  ;;  %p708_p13 = scmp.lt.s32.totalorder %s702_s5, %s702_s5 }
  0x1f   :  { %p709_p0 = por %p708_p13, %p707_p12 }
  0x21   :  { %p710_p1 = pnand %p709_p0, %p703_p11 }
  0x23   :  { %713 = shalt.err (!%p710_p1)
}
  0x24   :  { %32 = dma.hbm_to_vmem [thread:$0]  %s981_s1, 128, %s30_s13, [#allocation4]  }
  0x25   :  { %s714_s29 = scalar_lea.hbm %s987_s7, 1024 }
  0x26   :  { %p715_p2 = scmp.ne.s32.totalorder %s987_s7, %s714_s29  ;;  %p718_p3 = scmp.lt.u32.totalorder %s714_s29, %s987_s7 }
  0x28   :  { %p720_p4 = pnand %p718_p3, %p715_p2 }
  0x2a   :  { %723 = shalt.err (!%p720_p4)
}
  0x2b   :  { %s724_s17 = scalar_lea.vmem %s59_s15, 1024  ;;  %p729_p6 = scmp.lt.s32.totalorder %s59_s15, %s59_s15 }
  0x2c   :  { %p725_p5 = scmp.ne.s32.totalorder %s59_s15, %s724_s17  ;;  %p730_p7 = scmp.lt.s32.totalorder %s724_s17, %s724_s17 }
  0x2e   :  { %p731_p8 = por %p730_p7, %p729_p6 }
  0x30   :  { %p732_p9 = pnand %p731_p8, %p725_p5 }
  0x32   :  { %735 = shalt.err (!%p732_p9)
}
  0x33   :  { %64 = dma.hbm_to_vmem [thread:$0]  %s987_s7, 1024, %s59_s15, [#allocation7], %s789_s27, %s789_s27, %s790_s28  }
  0x34   :  { %s793_s19 = smov [#allocation9]   ;;  %s736_s23 = scalar_lea.hbm %s989_s9, 1024 }
  0x35   :  { %s72_s20 = sshll.u32 %s793_s19, 4  ;;  %p737_p10 = scmp.ne.s32.totalorder %s989_s9, %s736_s23  ;;  %s73_s20 = int_to_ptr.vmem [resolvable:$true] %s72_s20 }
  0x36   :  { %p740_p11 = scmp.lt.u32.totalorder %s736_s23, %s989_s9 }
  0x38   :  { %p742_p12 = pnand %p740_p11, %p737_p10 }
  0x3a   :  { %745 = shalt.err (!%p742_p12)
}
  0x3b   :  { %s746_s26 = scalar_lea.vmem %s73_s20, 1024  ;;  %p751_p0 = scmp.lt.s32.totalorder %s73_s20, %s73_s20 }
  0x3c   :  { %p747_p13 = scmp.ne.s32.totalorder %s73_s20, %s746_s26  ;;  %p752_p1 = scmp.lt.s32.totalorder %s746_s26, %s746_s26 }
  0x3e   :  { %p753_p2 = por %p752_p1, %p751_p0 }
  0x40   :  { %p754_p3 = pnand %p753_p2, %p747_p13 }
  0x42   :  { %757 = shalt.err (!%p754_p3)
}
  0x43   :  { %78 = dma.hbm_to_vmem [thread:$0]  %s989_s9, 1024, %s73_s20, [#allocation10], %s789_s27, %s789_s27, %s790_s28  }
  0x44   :  { %780 = dma.done.wait [#allocation4], 128  }
  0x45   :  { %781 = vsyncadd [#allocation4], 4294967168 }
  0x46   :  { %782 = dma.done.wait [#allocation7], 2048  }
  0x47   :  { %783 = vsyncadd [#allocation7], 4294965248 }
  0x48   :  { %784 = dma.done.wait [#allocation10], 1024  }
  0x49   :  { %785 = vsyncadd [#allocation10], 4294966272  ;;  %v794_v0 = vmov 0.0   ;;  %vm795_vm0 = vmmov 0   ;;  %vm113_vm1 = vcmask 1043456   ;;  %v100_v2 = vld [vmem:[#allocation3] sm:$0xff]  ;;  %v104_v19 = vlaneseq }
  0x4a   :  { %571 = vmatprep.subr.bf16.mxu0 %v794_v0  ;;  %573 = vmatprep.mubr.msk.bf16.mxu0 %vm795_vm0, %v794_v0  ;;  %v102_v1 = vld [vmem:[%s982_s2] sm:$0xf]  ;;  %v101_v4 = vpack.c.bf16 %v100_v2, %v100_v2  ;;  %v646_v5 = vld [vmem:[#allocation6] sm:$0xff]   ;;  %vm109_vm2 = vcmask 64512   ;;  %v647_v6 = vld [vmem:[#allocation6 + $0x8] sm:$0xff]   ;;  %v96_v21 = vstv %s980_s0  ;;  %s796_s1 = smov [#allocation11]  }
  0x4b   :  { %577 = vmatprep.subr.bf16.mxu1 %v794_v0  ;;  %593 = vmatprep.mubr.msk.bf16.mxu1 %vm795_vm0, %v794_v0  ;;  %v115_v3 = vsel %vm113_vm1, %v102_v1, 0  ;;  %v648_v7 = vld [vmem:[#allocation6 + $0x10] sm:$0xff]   ;;  %v649_v8 = vld [vmem:[#allocation6 + $0x18] sm:$0xff]   ;;  %v650_v9 = vld [vmem:[#allocation6 + $0x20] sm:$0xff]   ;;  %v105_v23 = vshrl.u32 %v104_v19, 7  ;;  %s503_s13 = sshll.u32 %s796_s1, 4  ;;  %s504_s13 = int_to_ptr.vmem [resolvable:$true] %s503_s13 }
  0x4c   :  { %572 = vmatpush3.bf16.msra.mxu0 %v115_v3  ;;  %578 = vmatpush3.bf16.msra.mxu1 %v646_v5  ;;  %v651_v10 = vld [vmem:[#allocation6 + $0x28] sm:$0xff]   ;;  %v652_v11 = vld [vmem:[#allocation6 + $0x30] sm:$0xff]   ;;  %v653_v12 = vld [vmem:[#allocation6 + $0x38] sm:$0xff]   ;;  %p763_p5 = scmp.lt.s32.totalorder %s504_s13, %s504_s13 }
  0x4d   :  { %597 = vmatprep.subr.bf16.mxu0 %v794_v0  ;;  %579 = vmatprep.subr.bf16.mxu1 %v794_v0  ;;  %v654_v13 = vld [vmem:[#allocation8] sm:$0xff]   ;;  %v655_v14 = vld [vmem:[#allocation8 + $0x8] sm:$0xff]   ;;  %v656_v15 = vld [vmem:[#allocation8 + $0x10] sm:$0xff]   ;;  %v106_v26 = vsub.s32 0, %v105_v23 }
  0x4e   :  { %v657_v16 = vld [vmem:[#allocation8 + $0x18] sm:$0xff]   ;;  %v658_v17 = vld [vmem:[#allocation8 + $0x20] sm:$0xff]   ;;  %v659_v18 = vld [vmem:[#allocation8 + $0x28] sm:$0xff]  }
  0x4f   :  { %574 = vmatmul.mubr.msk.bf16.vlgmr.msra.gmra.mrb[0].mxu0 %vm109_vm2, %v101_v4  ;;  %v95_v20 = vld [vmem:[%s983_s3] sm:$0x1]  ;;  %v660_v35 = vld [vmem:[#allocation8 + $0x30] sm:$0xff]   ;;  %v662_v37 = vld [vmem:[#allocation9] sm:$0xff]  }
  0x50   :  { %613 = vmatprep.mubr.msk.bf16.mxu0 %vm795_vm0, %v794_v0  ;;  %580 = vmatpush3.bf16.msra.mxu1 %v647_v6  ;;  %v97_v22 = vmul.f32 %v96_v21, %v95_v20  ;;  %v98_v24 = vld [vmem:[%s984_s4] sm:$0x1]  ;;  %v663_v38 = vld [vmem:[#allocation9 + $0x8] sm:$0xff]   ;;  %v664_v39 = vld [vmem:[#allocation9 + $0x10] sm:$0xff]  }
  0x51   :  { %581 = vmatprep.subr.bf16.mxu1 %v794_v0  ;;  %598 = vmatpush3.bf16.msra.mxu0 %v654_v13  ;;  %v661_v36 = vld [vmem:[#allocation8 + $0x38] sm:$0xff]   ;;  %v666_v41 = vld [vmem:[#allocation9 + $0x20] sm:$0xff]   ;;  %v667_v42 = vld [vmem:[#allocation9 + $0x28] sm:$0xff]  }
  0x52   :  { %599 = vmatprep.subr.bf16.mxu0 %v794_v0  ;;  %v99_v25 = vadd.f32 %v98_v24, %v97_v22  ;;  %v665_v40 = vld [vmem:[#allocation9 + $0x18] sm:$0xff]   ;;  %v668_v51 = vld [vmem:[#allocation9 + $0x30] sm:$0xff]  }
  0x53   :  { %v515_v43 = vld [vmem:[%s986_s6] ss:$0 sm:$0xff] }
  0x54   :  { %582 = vmatpush3.bf16.msra.mxu1 %v648_v7  ;;  %v107_v27 = vrot.slane %v99_v25, %v106_v26  ;;  %v669_v52 = vld [vmem:[#allocation9 + $0x38] sm:$0xff]  }
  0x55   :  { %583 = vmatprep.subr.bf16.mxu1 %v794_v0  ;;  %600 = vmatpush3.bf16.msra.mxu0 %v655_v14  ;;  %v524_v53 = vld [vmem:[%s988_s8] ss:$0 sm:$0xff]  ;;  %s758_s8 = scalar_lea.vmem %s504_s13, 128 }
  0x56   :  { %601 = vmatprep.subr.bf16.mxu0 %v794_v0  ;;  %v533_v61 = vld [vmem:[%s990_s10] ss:$0 sm:$0xff]  ;;  %p759_p4 = scmp.ne.s32.totalorder %s504_s13, %s758_s8  ;;  %p764_p6 = scmp.lt.s32.totalorder %s758_s8, %s758_s8 }
  0x58   :  { %584 = vmatpush3.bf16.msra.mxu1 %v649_v8  ;;  %p765_p7 = por %p764_p6, %p763_p5 }
  0x59   :  { %585 = vmatprep.subr.bf16.mxu1 %v794_v0  ;;  %602 = vmatpush3.bf16.msra.mxu0 %v656_v15 }
  0x5a   :  { %603 = vmatprep.subr.bf16.mxu0 %v794_v0  ;;  %p766_p8 = pnand %p765_p7, %p759_p4 }
  0x5c   :  { %586 = vmatpush3.bf16.msra.mxu1 %v650_v9 }
  0x5d   :  { %587 = vmatprep.subr.bf16.mxu1 %v794_v0  ;;  %604 = vmatpush3.bf16.msra.mxu0 %v657_v16 }
  0x5e   :  { %605 = vmatprep.subr.bf16.mxu0 %v794_v0 }
  0x60   :  { %588 = vmatpush3.bf16.msra.mxu1 %v651_v10 }
  0x61   :  { %589 = vmatprep.subr.bf16.mxu1 %v794_v0  ;;  %606 = vmatpush3.bf16.msra.mxu0 %v658_v17 }
  0x62   :  { %607 = vmatprep.subr.bf16.mxu0 %v794_v0 }
  0x64   :  { %590 = vmatpush3.bf16.msra.mxu1 %v652_v11 }
  0x65   :  { %591 = vmatprep.subr.bf16.mxu1 %v794_v0  ;;  %608 = vmatpush3.bf16.msra.mxu0 %v659_v18 }
  0x66   :  { %609 = vmatprep.subr.bf16.mxu0 %v794_v0 }
  0x68   :  { %592 = vmatpush3.bf16.msra.mxu1 %v653_v12 }
  0x69   :  { %617 = vmatprep.subr.bf16.mxu1 %v794_v0  ;;  %610 = vmatpush3.bf16.msra.mxu0 %v660_v35 }
  0x6a   :  { %611 = vmatprep.subr.bf16.mxu0 %v794_v0 }
  0x6d   :  { %612 = vmatpush3.bf16.msra.mxu0 %v661_v36 }
 0x122   :  { %v151_v28 = vpop.f32.mrb[0].mxu0 }
 0x123   :  { %v152_v29 = vadd.f32 %v151_v28, %v107_v27  ;;  %v575_v30 = vpop.f32.mrb[1].mxu0 }
 0x124   :  { %v154_v31 = vpop.f32.mrb[2].mxu0 }
 0x125   :  { %v157_v32 = vmax.f32 %v152_v29, 0.0  ;;  %v576_v33 = vpop.f32.mrb[3].mxu0 }
 0x127   :  { %v158_v34 = vpack.c.bf16 %v157_v32, %v157_v32 }
 0x129   :  { %594 = vmatmul.mubr.bf16.vlgmr.msra.gmra.mrb[0].mxu1 %v158_v34 }
 0x12a   :  { %633 = vmatprep.mubr.msk.bf16.mxu1 %vm795_vm0, %v794_v0  ;;  %618 = vmatpush3.bf16.msra.mxu1 %v662_v37 }
 0x12b   :  { %619 = vmatprep.subr.bf16.mxu1 %v794_v0 }
 0x12e   :  { %620 = vmatpush3.bf16.msra.mxu1 %v663_v38 }
 0x12f   :  { %621 = vmatprep.subr.bf16.mxu1 %v794_v0 }
 0x132   :  { %622 = vmatpush3.bf16.msra.mxu1 %v664_v39 }
 0x133   :  { %623 = vmatprep.subr.bf16.mxu1 %v794_v0 }
 0x136   :  { %624 = vmatpush3.bf16.msra.mxu1 %v665_v40 }
 0x137   :  { %625 = vmatprep.subr.bf16.mxu1 %v794_v0 }
 0x13a   :  { %626 = vmatpush3.bf16.msra.mxu1 %v666_v41 }
 0x13b   :  { %627 = vmatprep.subr.bf16.mxu1 %v794_v0 }
 0x13e   :  { %628 = vmatpush3.bf16.msra.mxu1 %v667_v42 }
 0x13f   :  { %629 = vmatprep.subr.bf16.mxu1 %v794_v0 }
 0x142   :  { %630 = vmatpush3.bf16.msra.mxu1 %v668_v51 }
 0x143   :  { %631 = vmatprep.subr.bf16.mxu1 %v794_v0 }
 0x146   :  { %632 = vmatpush3.bf16.msra.mxu1 %v669_v52 }
 0x1fc   :  { %v264_v44 = vpop.f32.mrb[0].mxu1 }
 0x1fd   :  { %v265_v45 = vadd.f32 %v515_v43, %v264_v44  ;;  %v595_v46 = vpop.f32.mrb[1].mxu1 }
 0x1fe   :  { %v267_v47 = vpop.f32.mrb[2].mxu1 }
 0x1ff   :  { %v270_v48 = vmax.f32 %v265_v45, 0.0  ;;  %v596_v49 = vpop.f32.mrb[3].mxu1 }
 0x201   :  { %v271_v50 = vpack.c.bf16 %v270_v48, %v270_v48 }
 0x203   :  { %614 = vmatmul.mubr.bf16.vlgmr.msra.gmra.mrb[4].mxu0 %v271_v50 }
 0x2d6   :  { %v377_v54 = vpop.f32.mrb[4].mxu0 }
 0x2d7   :  { %v378_v55 = vadd.f32 %v524_v53, %v377_v54  ;;  %v615_v56 = vpop.f32.mrb[5].mxu0 }
 0x2d8   :  { %v380_v57 = vpop.f32.mrb[6].mxu0 }
 0x2d9   :  { %v383_v58 = vmax.f32 %v378_v55, 0.0  ;;  %v616_v59 = vpop.f32.mrb[7].mxu0 }
 0x2db   :  { %v384_v60 = vpack.c.bf16 %v383_v58, %v383_v58 }
 0x2dd   :  { %634 = vmatmul.mubr.bf16.vlgmr.msra.gmra.mrb[4].mxu1 %v384_v60 }
 0x3b0   :  { %v490_v62 = vpop.f32.mrb[4].mxu1 }
 0x3b1   :  { %v491_v63 = vadd.f32 %v533_v61, %v490_v62  ;;  %v635_v0 = vpop.f32.mrb[5].mxu1 }
 0x3b2   :  { %v493_v1 = vpop.f32.mrb[6].mxu1 }
 0x3b3   :  { %496 = vst [vmem:[#allocation11] sm:$0xff] %v491_v63  ;;  %v636_v2 = vpop.f32.mrb[7].mxu1 }
 0x3b4   :  { %769 = shalt.err (!%p766_p8)
}
 0x3b5   :  { %s770_s10 = scalar_lea.hbm %s991_s11, 128 }
 0x3b6   :  { %p771_p9 = scmp.ne.s32.totalorder %s991_s11, %s770_s10  ;;  %p774_p10 = scmp.lt.u32.totalorder %s770_s10, %s991_s11 }
 0x3b8   :  { %p776_p11 = pnand %p774_p10, %p771_p9 }
 0x3ba   :  { %779 = shalt.err (!%p776_p11)
}
 0x3bb   :  { %506 = dma.vmem_to_hbm [thread:$0]  %s504_s13, 128, %s991_s11, [#allocation5]  }
 0x3bc   :  { %786 = dma.done.wait [#allocation5], 128  }
 0x3bd   :  { %787 = vsyncadd [#allocation5], 4294967168 }
 0x3be   :  { %510 = vsyncpa [#allocation4], 1 }
 0x3bf   :  { %511 = vsyncpa [#allocation7], 1 }
 0x3c0   :  { %512 = vsyncpa [#allocation10], 1 }
 0x3c1   :  { %513 = vsyncpa [#allocation5], 1 }

</bundles_post_ra>
